<compile_context>
chip_gen: v7x
topology: tpu7x:2x2x1
jax: 0.10.0
libtpu: 0.0.40
codegen_flags: <defaults>
</compile_context>

<pallas_src>
import functools

import jax
import jax.numpy as jnp
from jax.experimental import pallas as pl
from jax.experimental.pallas import tpu as pltpu

IN_FEATURES = 8       # self.affine in features
HIDDEN = 128          # self.affine out features
NUM_ACTIONS = 4       # self.action_layer out features
VALUE_LANE = 4        # lane holding the value head output in the fused slab
OUT_WIDTH = 8         # lane width of the fused (action-probs + value) output


def actor_critic_kernel(x_ref, w1_ref, b1_ref, wh_ref, bh_ref, out_ref):
    # x: (TB, 8)
    x = x_ref[...]

    # hidden = relu(affine(x))                       affine: 8 -> 128
    h = jnp.dot(x, w1_ref[...], preferred_element_type=jnp.float32) + b1_ref[...]
    h = jnp.maximum(h, 0.0)                          # (TB, 128)

    # Fused narrow heads: one MXU pass -> (TB, 8).
    # lanes 0..3 = action logits, lane 4 = state value, lanes 5..7 = zero pad.
    heads = jnp.dot(h, wh_ref[...], preferred_element_type=jnp.float32) + bh_ref[...]

    lane = jax.lax.broadcasted_iota(jnp.int32, (1, OUT_WIDTH), 1)
    act_mask = (lane < NUM_ACTIONS).astype(jnp.float32)      # (1, 8): 1 on action lanes
    val_mask = (lane == VALUE_LANE).astype(jnp.float32)      # (1, 8): 1 on value lane

    # Masked softmax over the 4 action lanes (additive -inf-style mask; exact
    # divide so probabilities sum to 1 to f32 precision).
    logits = heads + (act_mask - 1.0) * jnp.float32(1e30)    # non-action lanes ~ -1e30
    m = jnp.max(logits, axis=-1, keepdims=True)
    e = jnp.exp(logits - m)                                  # masked lanes underflow to 0
    probs = e / jnp.sum(e, axis=-1, keepdims=True)

    # Single blend, one narrow store: probs in lanes 0..3, value in lane 4.
    out_ref[...] = probs * act_mask + heads * val_mask


def _round_up(x, m):
    return ((x + m - 1) // m) * m


@functools.partial(jax.jit, static_argnames=("tb",))
def actor_critic_forward(state, params, *, tb=1024):
    """state: (B, 8) float32.  Returns (action_probs (B, 4), state_value (B, 1))."""
    w1, b1, wh, bh = params
    B = state.shape[0]

    # Batch tile: multiple of 8 sublanes; tiny batches stay one tile.
    TB = min(tb, _round_up(max(B, 1), 8))
    # Give v7x's two TensorCores at least 2 parallel grid steps when there is
    # enough work (no-op on single-TC v5e/v6e).
    if B >= 16:
        TB = min(TB, _round_up(-(-B // 2), 8))
    Bp = _round_up(B, TB)
    if Bp != B:
        state = jnp.pad(state, ((0, Bp - B), (0, 0)))

    out = pl.pallas_call(
        actor_critic_kernel,
        out_shape=jax.ShapeDtypeStruct((Bp, OUT_WIDTH), jnp.float32),
        grid=(Bp // TB,),
        in_specs=[
            pl.BlockSpec((TB, IN_FEATURES), lambda i: (i, 0)),        # state stream
            pl.BlockSpec((IN_FEATURES, HIDDEN), lambda i: (0, 0)),    # affine W (resident)
            pl.BlockSpec((1, HIDDEN), lambda i: (0, 0)),              # affine b
            pl.BlockSpec((HIDDEN, OUT_WIDTH), lambda i: (0, 0)),      # fused head W
            pl.BlockSpec((1, OUT_WIDTH), lambda i: (0, 0)),           # fused head b
        ],
        out_specs=pl.BlockSpec((TB, OUT_WIDTH), lambda i: (i, 0)),
        compiler_params=pltpu.CompilerParams(
            dimension_semantics=("parallel",)),
    )(state, w1, b1, wh, bh)

    action_probs = out[:B, :NUM_ACTIONS]
    state_value = out[:B, VALUE_LANE:VALUE_LANE + 1]
    return action_probs, state_value


def init_params(key):
    """Deterministic init mimicking nn.Linear's U(-1/sqrt(fan_in), 1/sqrt(fan_in)),
    with the two heads fused into one narrow (128, 8) weight/bias."""
    k1, k2, k3, k4, k5, k6 = jax.random.split(key, 6)

    def linear(kw, kb, fan_in, fan_out):
        bound = 1.0 / jnp.sqrt(float(fan_in))
        w = jax.random.uniform(kw, (fan_in, fan_out), jnp.float32, -bound, bound)
        b = jax.random.uniform(kb, (1, fan_out), jnp.float32, -bound, bound)
        return w, b

    w1, b1 = linear(k1, k2, IN_FEATURES, HIDDEN)   # self.affine
    wa, ba = linear(k3, k4, HIDDEN, NUM_ACTIONS)   # self.action_layer
    wv, bv = linear(k5, k6, HIDDEN, 1)             # self.value_layer

    # Fuse heads: cols 0..3 = action weights, col 4 = value weight, 5..7 zero.
    wh = jnp.zeros((HIDDEN, OUT_WIDTH), jnp.float32)
    wh = wh.at[:, :NUM_ACTIONS].set(wa).at[:, VALUE_LANE:VALUE_LANE + 1].set(wv)
    bh = jnp.zeros((1, OUT_WIDTH), jnp.float32)
    bh = bh.at[:, :NUM_ACTIONS].set(ba).at[:, VALUE_LANE:VALUE_LANE + 1].set(bv)
    return (w1, b1, wh, bh), (w1, b1, wa, ba, wv, bv)


if __name__ == "__main__":
    key = jax.random.PRNGKey(0)
    pkey, skey, akey = jax.random.split(key, 3)

    params, raw = init_params(pkey)
    w1, b1, wa, ba, wv, bv = raw

    B = 2  # small batch of states; the original module takes a single (8,) state
    state = jax.random.normal(skey, (B, 8), jnp.float32)

    action_probs, state_value = actor_critic_forward(state, params)
    jax.block_until_ready((action_probs, state_value))

    # Pure-JAX reference of the same forward math.
    h_ref = jnp.maximum(state @ w1 + b1, 0.0)
    probs_ref = jax.nn.softmax(h_ref @ wa + ba, axis=-1)
    value_ref = h_ref @ wv + bv
    assert bool(jnp.allclose(action_probs, probs_ref, atol=1e-3, rtol=1e-3))
    assert bool(jnp.allclose(state_value, value_ref, atol=1e-3, rtol=1e-3))
    assert bool(jnp.allclose(jnp.sum(action_probs, axis=-1), 1.0, atol=1e-3))

    # Categorical sample + log_prob (stochastic part of forward), plain JAX glue.
    # TODO(synk): for single-state RL deployment, fuse sampling into the kernel
    # tail (pltpu.prng_seed + prng_random_bits + cumulative compare over the 4
    # prob lanes) to avoid extra tiny XLA kernels at B~1.
    logits = jnp.log(jnp.clip(action_probs, 1e-30, 1.0))
    actions = jax.random.categorical(akey, logits, axis=-1)
    logprobs = logits[jnp.arange(B), actions]
    jax.block_until_ready((actions, logprobs))

    assert action_probs.shape == (B, NUM_ACTIONS)
    assert state_value.shape == (B, 1)
    assert actions.shape == (B,)

    print("KERNEL_OK")
</pallas_src>

<mosaic_0001>
module attributes {stable_mosaic.version = 11 : i64} {
  func.func @actor_critic_kernel(%arg0: i32, %arg1: memref<8x8xf32, #tpu.memory_space<vmem>>, %arg2: memref<8x128xf32, #tpu.memory_space<vmem>>, %arg3: memref<1x128xf32, #tpu.memory_space<vmem>>, %arg4: memref<128x8xf32, #tpu.memory_space<vmem>>, %arg5: memref<1x8xf32, #tpu.memory_space<vmem>>, %arg6: memref<8x8xf32, #tpu.memory_space<vmem>>) attributes {dimension_semantics = [#tpu.dimension_semantics<parallel>], iteration_bounds = array<i64: 1>, scalar_prefetch = 0 : i64, scratch_operands = 0 : i64, tpu.core_type = #tpu.core_type<tc>, window_params = [{transform_indices = @transform_0, window_bounds = array<i64: 8, 8>}, {pipeline_mode = #tpu.pipeline_mode<synchronous>, transform_indices = @transform_1, window_bounds = array<i64: 8, 128>}, {pipeline_mode = #tpu.pipeline_mode<synchronous>, transform_indices = @transform_2, window_bounds = array<i64: 1, 128>}, {pipeline_mode = #tpu.pipeline_mode<synchronous>, transform_indices = @transform_3, window_bounds = array<i64: 128, 8>}, {pipeline_mode = #tpu.pipeline_mode<synchronous>, transform_indices = @transform_4, window_bounds = array<i64: 1, 8>}, {transform_indices = @transform_5, window_bounds = array<i64: 8, 8>}]} {
    %c0 = arith.constant 0 : index
    %c0_0 = arith.constant 0 : index
    %0 = vector.load %arg1[%c0, %c0_0] : memref<8x8xf32, #tpu.memory_space<vmem>>, vector<8x8xf32>
    %c0_1 = arith.constant 0 : index
    %c0_2 = arith.constant 0 : index
    %1 = vector.load %arg2[%c0_1, %c0_2] : memref<8x128xf32, #tpu.memory_space<vmem>>, vector<8x128xf32>
    %cst = arith.constant dense<0.000000e+00> : vector<8x128xf32>
    %2 = tpu.matmul %0, %1, %cst {dimension_numbers = #tpu.dot_dimension_numbers<[1], [0], [0], [1], [0, 0, 1, 1], [], []>} : vector<8x8xf32>, vector<8x128xf32>, vector<8x128xf32> -> vector<8x128xf32>
    %c0_3 = arith.constant 0 : index
    %c0_4 = arith.constant 0 : index
    %3 = vector.load %arg3[%c0_3, %c0_4] : memref<1x128xf32, #tpu.memory_space<vmem>>, vector<1x128xf32>
    %4 = vector.broadcast %3 : vector<1x128xf32> to vector<8x128xf32>
    %5 = arith.addf %2, %4 : vector<8x128xf32>
    %cst_5 = arith.constant 0.000000e+00 : f32
    %6 = vector.broadcast %cst_5 : f32 to vector<8x128xf32>
    %7 = arith.maximumf %5, %6 : vector<8x128xf32>
    %c0_6 = arith.constant 0 : index
    %c0_7 = arith.constant 0 : index
    %8 = vector.load %arg4[%c0_6, %c0_7] : memref<128x8xf32, #tpu.memory_space<vmem>>, vector<128x8xf32>
    %cst_8 = arith.constant dense<0.000000e+00> : vector<8x8xf32>
    %9 = tpu.matmul %7, %8, %cst_8 {dimension_numbers = #tpu.dot_dimension_numbers<[1], [0], [0], [1], [0, 0, 1, 1], [], []>} : vector<8x128xf32>, vector<128x8xf32>, vector<8x8xf32> -> vector<8x8xf32>
    %c0_9 = arith.constant 0 : index
    %c0_10 = arith.constant 0 : index
    %10 = vector.load %arg5[%c0_9, %c0_10] : memref<1x8xf32, #tpu.memory_space<vmem>>, vector<1x8xf32>
    %11 = vector.broadcast %10 : vector<1x8xf32> to vector<8x8xf32>
    %12 = arith.addf %9, %11 : vector<8x8xf32>
    %13 = tpu.iota {dimensions = array<i32: 1>} : vector<1x8xi32>
    %c4_i32 = arith.constant 4 : i32
    %14 = vector.broadcast %c4_i32 : i32 to vector<1x8xi32>
    %15 = arith.cmpi slt, %13, %14 : vector<1x8xi32>
    %16 = arith.extui %15 : vector<1x8xi1> to vector<1x8xi32>
    %17 = arith.sitofp %16 : vector<1x8xi32> to vector<1x8xf32>
    %c4_i32_11 = arith.constant 4 : i32
    %18 = vector.broadcast %c4_i32_11 : i32 to vector<1x8xi32>
    %19 = arith.cmpi eq, %13, %18 : vector<1x8xi32>
    %20 = arith.extui %19 : vector<1x8xi1> to vector<1x8xi32>
    %21 = arith.sitofp %20 : vector<1x8xi32> to vector<1x8xf32>
    %cst_12 = arith.constant 1.000000e+00 : f32
    %22 = vector.broadcast %cst_12 : f32 to vector<1x8xf32>
    %23 = arith.subf %17, %22 : vector<1x8xf32>
    %cst_13 = arith.constant 1.000000e+30 : f32
    %24 = vector.broadcast %cst_13 : f32 to vector<1x8xf32>
    %25 = arith.mulf %23, %24 : vector<1x8xf32>
    %26 = vector.broadcast %25 : vector<1x8xf32> to vector<8x8xf32>
    %27 = arith.addf %12, %26 : vector<8x8xf32>
    %cst_14 = arith.constant dense<0xFF800000> : vector<8xf32>
    %28 = vector.multi_reduction <maximumf>, %27, %cst_14 [1] : vector<8x8xf32> to vector<8xf32>
    %29 = vector.shape_cast %28 : vector<8xf32> to vector<8x1xf32>
    %30 = vector.broadcast %29 : vector<8x1xf32> to vector<8x8xf32>
    %31 = arith.subf %27, %30 : vector<8x8xf32>
    %32 = math.exp %31 : vector<8x8xf32>
    %cst_15 = arith.constant dense<0.000000e+00> : vector<8xf32>
    %33 = vector.multi_reduction <add>, %32, %cst_15 [1] : vector<8x8xf32> to vector<8xf32>
    %34 = vector.shape_cast %33 : vector<8xf32> to vector<8x1xf32>
    %35 = vector.broadcast %34 : vector<8x1xf32> to vector<8x8xf32>
    %36 = arith.divf %32, %35 : vector<8x8xf32>
    %37 = vector.broadcast %17 : vector<1x8xf32> to vector<8x8xf32>
    %38 = arith.mulf %36, %37 : vector<8x8xf32>
    %39 = vector.broadcast %21 : vector<1x8xf32> to vector<8x8xf32>
    %40 = arith.mulf %12, %39 : vector<8x8xf32>
    %41 = arith.addf %38, %40 : vector<8x8xf32>
    %c0_16 = arith.constant 0 : index
    %c0_17 = arith.constant 0 : index
    %42 = vector.load %arg6[%c0_16, %c0_17] : memref<8x8xf32, #tpu.memory_space<vmem>>, vector<8x8xf32>
    tpu.vector_store %arg6[%c0_16, %c0_17], %41 {strides = array<i32>} : memref<8x8xf32, #tpu.memory_space<vmem>>, vector<8x8xf32>,
    return
  }
  func.func @transform_0(%arg0: i32) -> (i32, i32) {
    %c0_i32 = arith.constant 0 : i32
    %c0_i32_0 = arith.constant 0 : i32
    return %arg0, %c0_i32 : i32, i32
  }
  func.func @transform_1(%arg0: i32) -> (i32, i32) {
    %c0_i32 = arith.constant 0 : i32
    %c0_i32_0 = arith.constant 0 : i32
    %c0_i32_1 = arith.constant 0 : i32
    return %c0_i32, %c0_i32_0 : i32, i32
  }
  func.func @transform_2(%arg0: i32) -> (i32, i32) {
    %c0_i32 = arith.constant 0 : i32
    %c0_i32_0 = arith.constant 0 : i32
    %c0_i32_1 = arith.constant 0 : i32
    return %c0_i32, %c0_i32_0 : i32, i32
  }
  func.func @transform_3(%arg0: i32) -> (i32, i32) {
    %c0_i32 = arith.constant 0 : i32
    %c0_i32_0 = arith.constant 0 : i32
    %c0_i32_1 = arith.constant 0 : i32
    return %c0_i32, %c0_i32_0 : i32, i32
  }
  func.func @transform_4(%arg0: i32) -> (i32, i32) {
    %c0_i32 = arith.constant 0 : i32
    %c0_i32_0 = arith.constant 0 : i32
    %c0_i32_1 = arith.constant 0 : i32
    return %c0_i32, %c0_i32_0 : i32, i32
  }
  func.func @transform_5(%arg0: i32) -> (i32, i32) {
    %c0_i32 = arith.constant 0 : i32
    %c0_i32_0 = arith.constant 0 : i32
    return %arg0, %c0_i32 : i32, i32
  }
}

</mosaic_0001>

<bundles_post_ra>
// kernel: actor_critic_forward.1
= control target key start
LH: loop header
LB: loop body
LE: loop exit
PB: predicated region body
PF: predicated region fallthrough
CT: control target
= control target key end

     0   :  { %vm29_vm0 = vcmask 64512   ;;  %v323_v0 = vmov 0.0   ;;  %vm324_vm1 = vmmov 0   ;;  %v325_v4 = vmov 0.0|0.0   ;;  %s428_s1 = inlined_call_operand.vmem [shape: f32[8,128], index: 1, kind: input, shape index: {}]   ;;  %s429_s0 = inlined_call_operand.vmem [shape: f32[8,8], index: 0, kind: input, shape index: {}]   ;;  %s430_s3 = inlined_call_operand.vmem [shape: f32[128,8], index: 3, kind: input, shape index: {}]   ;;  %s431_s2 = inlined_call_operand.vmem [shape: f32[1,128], index: 2, kind: input, shape index: {}]   ;;  %s432_s4 = inlined_call_operand.vmem [shape: f32[1,8], index: 4, kind: input, shape index: {}]   ;;  %s433_s5 = inlined_call_operand.vmem [shape: f32[8,8], index: 5, kind: output, shape index: {}]  }
   0x1   :  { %252 = vmatprep.subr.mxu0 %v323_v0  ;;  %v21_v1 = vld [vmem:[%s428_s1] sm:$0xff]  ;;  %254 = vmatprep.mubr.msk.f32.mxu0 %vm324_vm1, %v323_v0  ;;  %v105_v5 = vld [vmem:[%s430_s3 + $0x8] sm:$0xff]  ;;  %v106_v6 = vld [vmem:[%s430_s3 + $0x10] sm:$0xff]  ;;  %v197_v33 = vlaneseq }
   0x2   :  { %v20_v2 = vld [vmem:[%s429_s0] sm:$0xff]  ;;  %253 = vmatpush3.msra.mxu0 %v21_v1  ;;  %292 = vmatprep.subr.bf16.mxu1 %v325_v4  ;;  %v107_v7 = vld [vmem:[%s430_s3 + $0x18] sm:$0xff]  ;;  %v109_v11 = vld [vmem:[%s430_s3 + $0x28] sm:$0xff] }
   0x3   :  { %v104_v3 = vld [vmem:[%s430_s3] sm:$0xff]  ;;  %255 = vmatmul.mubr.msk.f32.vlgmr.msra.gmra.mrb[0].mxu0 %vm29_vm0, %v20_v2  ;;  %289 = vmatprep.mubr.msk.f32.mxu1 %vm324_vm1, %v323_v0  ;;  %v296_v9 = vpack.c.bf16 %v107_v7, %v106_v6  ;;  %v110_v13 = vld [vmem:[%s430_s3 + $0x30] sm:$0xff]  ;;  %v111_v14 = vld [vmem:[%s430_s3 + $0x38] sm:$0xff]  ;;  %v198_v34 = vand.u32 127, %v197_v33 }
   0x4   :  { %v293_v8 = vpack.c.bf16 %v105_v5, %v104_v3  ;;  %v108_v10 = vld [vmem:[%s430_s3 + $0x20] sm:$0xff]  ;;  %v302_v15 = vpack.c.bf16 %v111_v14, %v110_v13  ;;  %v113_v17 = vld [vmem:[%s430_s3 + $0x48] sm:$0xff]  ;;  %v114_v19 = vld [vmem:[%s430_s3 + $0x50] sm:$0xff] }
   0x5   :  { %v299_v12 = vpack.c.bf16 %v109_v11, %v108_v10  ;;  %v112_v16 = vld [vmem:[%s430_s3 + $0x40] sm:$0xff]  ;;  %v115_v20 = vld [vmem:[%s430_s3 + $0x58] sm:$0xff]  ;;  %v117_v23 = vld [vmem:[%s430_s3 + $0x68] sm:$0xff]  ;;  %vm199_vm2 = vcmp.lt.s32.totalorder %v198_v34, 4  ;;  %vm202_vm3 = vcmp.eq.s32.totalorder %v198_v34, 4 }
   0x6   :  { %294 = vmatpush3.bf16.msra.mxu1 %v293_v8  ;;  %v305_v18 = vpack.c.bf16 %v113_v17, %v112_v16  ;;  %v308_v21 = vpack.c.bf16 %v115_v20, %v114_v19  ;;  %v116_v22 = vld [vmem:[%s430_s3 + $0x60] sm:$0xff]  ;;  %v118_v25 = vld [vmem:[%s430_s3 + $0x70] sm:$0xff]  ;;  %v119_v26 = vld [vmem:[%s430_s3 + $0x78] sm:$0xff]  ;;  %v230_v35 = vsel %vm199_vm2, 1.0, %v323_v0  ;;  %v231_v40 = vsel %vm202_vm3, 1.0, %v323_v0 }
   0x7   :  { %295 = vmatprep.subr.bf16.mxu1 %v325_v4  ;;  %v311_v24 = vpack.c.bf16 %v117_v23, %v116_v22  ;;  %v314_v27 = vpack.c.bf16 %v119_v26, %v118_v25  ;;  %v227_v28 = vld [vmem:[%s431_s2] ss:$0 sm:$0xff]  ;;  %v232_v36 = vadd.f32 -1.0, %v230_v35 }
   0x8   :  { %v229_v37 = vld [vmem:[%s432_s4] ss:$0 sm:$0xff] }
   0x9   :  { %v206_v38 = vmul.f32 1e+30, %v232_v36 }
   0xa   :  { %297 = vmatpush3.bf16.msra.mxu1 %v296_v9 }
   0xb   :  { %298 = vmatprep.subr.bf16.mxu1 %v325_v4 }
   0xe   :  { %300 = vmatpush3.bf16.msra.mxu1 %v299_v12 }
   0xf   :  { %301 = vmatprep.subr.bf16.mxu1 %v325_v4 }
  0x12   :  { %303 = vmatpush3.bf16.msra.mxu1 %v302_v15 }
  0x13   :  { %304 = vmatprep.subr.bf16.mxu1 %v325_v4 }
  0x16   :  { %306 = vmatpush3.bf16.msra.mxu1 %v305_v18 }
  0x17   :  { %307 = vmatprep.subr.bf16.mxu1 %v325_v4 }
  0x1a   :  { %309 = vmatpush3.bf16.msra.mxu1 %v308_v21 }
  0x1b   :  { %310 = vmatprep.subr.bf16.mxu1 %v325_v4 }
  0x1e   :  { %312 = vmatpush3.bf16.msra.mxu1 %v311_v24 }
  0x1f   :  { %313 = vmatprep.subr.bf16.mxu1 %v325_v4 }
  0x22   :  { %315 = vmatpush3.bf16.msra.mxu1 %v314_v27 }
  0xd6   :  { %v99_v29 = vpop.f32.mrb[0].mxu0 }
  0xd7   :  { %v100_v30 = vadd.f32 %v227_v28, %v99_v29  ;;  %v256_v31 = vpop.f32.mrb[1].mxu0 }
  0xd9   :  { %v103_v32 = vmax.f32 %v100_v30, 0.0 }
  0xdb   :  { %290 = vmatmul.mubr.f32.vlgmr.msra.gmra.mrb[0].mxu1 %v103_v32 }
 0x1ae   :  { %v193_v39 = vpop.f32.mrb[0].mxu1 }
 0x1af   :  { %v194_v41 = vadd.f32 %v229_v37, %v193_v39  ;;  %v291_v42 = vpop.f32.mrb[1].mxu1 }
 0x1b1   :  { %v220_v43 = vmul.f32 %v231_v40, %v194_v41  ;;  %v207_v44 = vadd.f32 %v206_v38, %v194_v41 }
 0x1b3   :  { %v208_v45 = vsel %vm29_vm0, %v207_v44, -inf }
 0x1b4   :  { %209 = vmax.xlane.f32.xlu0 %v208_v45 }
 0x241   :  { %v210_v46 = vpop.xlane.xlu0 %209 }
 0x242   :  { %v211_v47 = vsub.f32 %v207_v44, %v210_v46 }
 0x244   :  { %v212_v48 = vmul.f32 1.442695, %v211_v47 }
 0x246   :  { %319 = vpow2.f32 %v212_v48 }
 0x250   :  { %v320_v49 = vpop.eup %319 }
 0x251   :  { %v214_v50 = vsel %vm29_vm0, %v320_v49, 0.0 }
 0x252   :  { %215 = vadd.xlane.f32.xlu0 %v214_v50 }
 0x2df   :  { %v216_v51 = vpop.xlane.xlu0 %215 }
 0x2e0   :  { %321 = vrcp.f32 %v216_v51 }
 0x2ea   :  { %v322_v52 = vpop.eup %321 }
 0x2eb   :  { %v218_v53 = vmul.f32 %v322_v52, %v320_v49 }
 0x2ed   :  { %v219_v54 = vmul.f32 %v230_v35, %v218_v53 }
 0x2ef   :  { %v221_v55 = vadd.f32 %v220_v43, %v219_v54 }
 0x2f1   :  { %222 = vst.msk [vmem:[%s433_s5] sm:$0xff] %vm29_vm0, %v221_v55 }

</bundles_post_ra>
